<compile_context>
chip_gen: v5e
topology: v5e:2x2
jax: 0.10.0
libtpu: 0.0.40
codegen_flags: <defaults>
</compile_context>

<pallas_src>
import functools

import jax
import jax.numpy as jnp
from jax import lax
from jax.experimental import pallas as pl
from jax.experimental.pallas import tpu as pltpu


def _criterion_kernel(s1_ref, s2_ref, out_ref, acc_ref, *,
                      tao: float, inv_c: float, tb: int, spc: int,
                      batch: int, mask_rows: bool):
    # Grid: (core_split "parallel", per-core batch blocks "arbitrary").
    c = pl.program_id(0)
    i = pl.program_id(1)

    @pl.when(i == 0)
    def _():
        acc_ref[...] = jnp.zeros_like(acc_ref)

    s1 = s1_ref[...].astype(jnp.float32)          # (TB, C)
    s2 = s2_ref[...].astype(jnp.float32)          # (TB, C)

    if mask_rows:
        # Rows at/after B (ragged last block or the clamped tail block of an
        # uneven 2-way split) are forced to 1.0 BEFORE log2 so they contribute
        # exactly 0 -- no NaNs from garbage in the partially-read block.
        row0 = (c * spc + i) * tb
        rows = lax.broadcasted_iota(jnp.int32, (tb, 1), 0) + row0
        valid = rows < batch                                       # (TB, 1)
        s1 = jnp.where(valid, s1, jnp.float32(1.0))
        s2 = jnp.where(valid, s2, jnp.float32(1.0))

    # Folded entropy: -sum(p*log2(p)) == log2(S) - sum(s*log2(s))/S, S=sum(s).
    sum1 = jnp.sum(s1, axis=1, keepdims=True)                      # (TB, 1)
    sum2 = jnp.sum(s2, axis=1, keepdims=True)
    slog1 = jnp.sum(s1 * jnp.log2(s1), axis=1, keepdims=True)
    slog2 = jnp.sum(s2 * jnp.log2(s2), axis=1, keepdims=True)
    ent = 0.5 * ((jnp.log2(sum1) - slog1 / sum1)
                 + (jnp.log2(sum2) - slog2 / sum2))                # (TB, 1)

    # per-row L1 distance: mean_j |s1 - s2|
    l1 = jnp.sum(jnp.abs(s1 - s2), axis=1, keepdims=True) * inv_c  # (TB, 1)

    # (1 - sigmoid(ent - tao)) == sigmoid(tao - ent); 1/alpha and 1/B are
    # folded into the wrapper-side scale.  (.detach() is a forward no-op.)
    w = jax.nn.sigmoid(tao - ent)                                  # (TB, 1)

    acc_ref[...] += jnp.sum(w * l1, keepdims=True)                 # (1, 1)

    @pl.when(i == spc - 1)
    def _():
        out_ref[...] = acc_ref[...].reshape(out_ref.shape)


def _tile_budget():
    """Returns (per-block f32 working-set budget, scoped vmem limit) in bytes."""
    try:
        info = pltpu.get_tpu_info()
        cap = getattr(info, "vmem_capacity_bytes", None)
    except Exception:  # interpret mode / API mismatch -> conservative default
        cap = None
    if cap is not None and cap >= 100 * 1024 * 1024:
        # v5e / v6e: 128 MiB physical VMEM -> big blocks, 64 MiB scoped limit.
        return 8 * 1024 * 1024, 64 * 1024 * 1024
    # v7x (64 MiB per TensorCore) or unknown: leave room for the f32 upcast
    # temporaries on top of 2 inputs x 2-3 pipeline buffers.
    return 4 * 1024 * 1024, 44 * 1024 * 1024


def _input_block_spec(block_shape, index_map, deep_buffering):
    if deep_buffering:
        try:
            # 3-deep buffering hides DMA issue latency when blocks are small.
            return pl.BlockSpec(block_shape, index_map,
                                pipeline_mode=pl.Buffered(3))
        except (AttributeError, TypeError):
            pass  # older BlockSpec signature: fall back to default 2 buffers
    return pl.BlockSpec(block_shape, index_map)


def criterion_backbone(scores1, scores2, tao: float = 0.1, alpha: float = 128.0,
                       tb: int | None = None):
    assert scores1.ndim == 2 and scores1.shape == scores2.shape
    B, C = scores1.shape
    itemsize = jnp.dtype(scores1.dtype).itemsize
    row_align = {4: 8, 2: 16, 1: 32}.get(itemsize, 8)

    work_budget, vmem_limit = _tile_budget()
    if tb is None:
        # Size blocks by their f32 working footprint (dtype-independent); no
        # artificial row cap -- big blocks amortize the ~0.35us/step overhead.
        tb = max(row_align, work_budget // max(1, C * 4))
    tb = max(row_align, (int(tb) // row_align) * row_align)
    if B <= tb:
        tb = ((B + row_align - 1) // row_align) * row_align

    nblocks = pl.cdiv(B, tb)
    # Split the batch-block stream across (up to) 2 TensorCores.  On 1-TC
    # chips the "parallel" axis runs sequentially and remains correct.
    num_splits = 2 if nblocks >= 2 else 1
    spc = pl.cdiv(nblocks, num_splits)                 # steps per core
    mask_rows = (num_splits * spc * tb) != B           # any ragged/extra rows?
    deep_buffering = (tb * C * itemsize <= (1 << 20)) and (spc >= 3)

    def in_index_map(c_idx, i_idx):
        # Clamp so the trailing grid point of an uneven split stays in bounds;
        # its rows are fully masked out in-kernel (contribute exactly 0).
        return (jnp.minimum(c_idx * spc + i_idx, nblocks - 1), 0)

    kernel = functools.partial(
        _criterion_kernel,
        tao=float(tao), inv_c=1.0 / C,
        tb=tb, spc=spc, batch=B, mask_rows=mask_rows)

    cost = pl.CostEstimate(
        flops=10 * B * C,
        transcendentals=2 * B * C + 3 * B,
        bytes_accessed=2 * B * C * itemsize + 4 * num_splits,
    )

    in_spec = _input_block_spec((tb, C), in_index_map, deep_buffering)

    partials = pl.pallas_call(
        kernel,
        out_shape=jax.ShapeDtypeStruct((num_splits, 1, 1), jnp.float32),
        grid=(num_splits, spc),
        in_specs=[in_spec, in_spec],
        out_specs=pl.BlockSpec((1, 1, 1), lambda c_idx, i_idx: (c_idx, 0, 0)),
        scratch_shapes=[pltpu.VMEM((1, 1), jnp.float32)],
        compiler_params=pltpu.CompilerParams(
            dimension_semantics=("parallel", "arbitrary"),
            vmem_limit_bytes=vmem_limit,
        ),
        cost_estimate=cost,
    )(scores1, scores2)

    # Single cross-core add + the one 1/(alpha*B) scale, done once here.
    return jnp.sum(partials) * (1.0 / (float(alpha) * B))


def _criterion_backbone_ref(scores1, scores2, tao=0.1, alpha=128.0):
    s1 = scores1.astype(jnp.float32)
    s2 = scores2.astype(jnp.float32)
    p1 = s1 / jnp.sum(s1, axis=1, keepdims=True)
    p2 = s2 / jnp.sum(s2, axis=1, keepdims=True)
    ent = -jnp.sum(p1 * jnp.log2(p1) + p2 * jnp.log2(p2), axis=1) / 2.0
    loss = jnp.mean(jnp.abs(s1 - s2), axis=1)
    w = (1.0 - jax.nn.sigmoid(ent - tao)) / alpha
    return jnp.mean(w * loss)


if __name__ == "__main__":
    key = jax.random.PRNGKey(0)
    ks = jax.random.split(key, 8)

    def _mk(k, shape):
        return jax.random.uniform(k, shape, jnp.float32, minval=0.05, maxval=1.0)

    cases = [
        # (B, C, tb) -- tb=None lets the byte-budget sizing pick the block.
        (8, 32, None),      # single full block, no masking
        (6, 32, None),      # block rows > B: in-kernel row masking
        (200, 48, 64),      # multi-block, 2-way core split, ragged last block
        (144, 32, 48),      # odd block count: clamped, fully-masked tail block
        (1000, 32, 32),     # many small blocks: deep (3-buffer) pipelining path
    ]
    for idx, (B, C, tb) in enumerate(cases):
        k1, k2 = jax.random.split(ks[idx], 2)
        s1 = _mk(k1, (B, C))
        s2 = _mk(k2, (B, C))
        out = jax.block_until_ready(criterion_backbone(s1, s2, tb=tb))
        ref = jax.block_until_ready(_criterion_backbone_ref(s1, s2))
        assert jnp.allclose(out, ref, rtol=1e-5, atol=1e-6), (idx, out, ref)

    print("KERNEL_OK")
</pallas_src>

<mosaic_0001>
module attributes {stable_mosaic.version = 11 : i64} {
  func.func @_criterion_kernel(%arg0: i32, %arg1: i32, %arg2: memref<8x32xf32, #tpu.memory_space<vmem>>, %arg3: memref<8x32xf32, #tpu.memory_space<vmem>>, %arg4: memref<1x1x1xf32, #tpu.memory_space<vmem>>, %arg5: memref<1x1xf32, #tpu.memory_space<vmem>>) attributes {dimension_semantics = [#tpu.dimension_semantics<parallel>, #tpu.dimension_semantics<arbitrary>], iteration_bounds = array<i64: 1, 1>, scalar_prefetch = 0 : i64, scratch_operands = 1 : i64, tpu.core_type = #tpu.core_type<tc>, window_params = [{transform_indices = @transform_0, window_bounds = array<i64: 8, 32>}, {transform_indices = @transform_1, window_bounds = array<i64: 8, 32>}, {transform_indices = @transform_2, window_bounds = array<i64: 1, 1, 1>}]} {
    %c0_i32 = arith.constant 0 : i32
    %0 = arith.cmpi eq, %arg1, %c0_i32 : i32
    %1 = arith.extui %0 : i1 to i32
    %c0_i32_0 = arith.constant 0 : i32
    %2 = arith.cmpi ne, %1, %c0_i32_0 : i32
    scf.if %2 {
      %cst_23 = arith.constant 0.000000e+00 : f32
      %63 = vector.broadcast %cst_23 : f32 to vector<1x1xf32>
      %c0_24 = arith.constant 0 : index
      %c0_25 = arith.constant 0 : index
      %64 = vector.load %arg5[%c0_24, %c0_25] : memref<1x1xf32, #tpu.memory_space<vmem>>, vector<1x1xf32>
      tpu.vector_store %arg5[%c0_24, %c0_25], %63 {strides = array<i32>} : memref<1x1xf32, #tpu.memory_space<vmem>>, vector<1x1xf32>,
    } else {
    }
    %c0 = arith.constant 0 : index
    %c0_1 = arith.constant 0 : index
    %3 = vector.load %arg2[%c0, %c0_1] : memref<8x32xf32, #tpu.memory_space<vmem>>, vector<8x32xf32>
    %c0_2 = arith.constant 0 : index
    %c0_3 = arith.constant 0 : index
    %4 = vector.load %arg3[%c0_2, %c0_3] : memref<8x32xf32, #tpu.memory_space<vmem>>, vector<8x32xf32>
    %cst = arith.constant dense<0.000000e+00> : vector<8xf32>
    %5 = vector.multi_reduction <add>, %3, %cst [1] : vector<8x32xf32> to vector<8xf32>
    %6 = vector.shape_cast %5 : vector<8xf32> to vector<8x1xf32>
    %cst_4 = arith.constant dense<0.000000e+00> : vector<8xf32>
    %7 = vector.multi_reduction <add>, %4, %cst_4 [1] : vector<8x32xf32> to vector<8xf32>
    %8 = vector.shape_cast %7 : vector<8xf32> to vector<8x1xf32>
    %9 = math.log %3 : vector<8x32xf32>
    %cst_5 = arith.constant 2.000000e+00 : f32
    %10 = math.log %cst_5 : f32
    %11 = vector.broadcast %10 : f32 to vector<8x32xf32>
    %12 = arith.divf %9, %11 : vector<8x32xf32>
    %13 = arith.mulf %3, %12 : vector<8x32xf32>
    %cst_6 = arith.constant dense<0.000000e+00> : vector<8xf32>
    %14 = vector.multi_reduction <add>, %13, %cst_6 [1] : vector<8x32xf32> to vector<8xf32>
    %15 = vector.shape_cast %14 : vector<8xf32> to vector<8x1xf32>
    %16 = math.log %4 : vector<8x32xf32>
    %cst_7 = arith.constant 2.000000e+00 : f32
    %17 = math.log %cst_7 : f32
    %18 = vector.broadcast %17 : f32 to vector<8x32xf32>
    %19 = arith.divf %16, %18 : vector<8x32xf32>
    %20 = arith.mulf %4, %19 : vector<8x32xf32>
    %cst_8 = arith.constant dense<0.000000e+00> : vector<8xf32>
    %21 = vector.multi_reduction <add>, %20, %cst_8 [1] : vector<8x32xf32> to vector<8xf32>
    %22 = vector.shape_cast %21 : vector<8xf32> to vector<8x1xf32>
    %23 = math.log %6 : vector<8x1xf32>
    %cst_9 = arith.constant 2.000000e+00 : f32
    %24 = math.log %cst_9 : f32
    %25 = vector.broadcast %24 : f32 to vector<8x1xf32>
    %26 = arith.divf %23, %25 : vector<8x1xf32>
    %27 = arith.divf %15, %6 : vector<8x1xf32>
    %28 = arith.subf %26, %27 : vector<8x1xf32>
    %29 = math.log %8 : vector<8x1xf32>
    %cst_10 = arith.constant 2.000000e+00 : f32
    %30 = math.log %cst_10 : f32
    %31 = vector.broadcast %30 : f32 to vector<8x1xf32>
    %32 = arith.divf %29, %31 : vector<8x1xf32>
    %33 = arith.divf %22, %8 : vector<8x1xf32>
    %34 = arith.subf %32, %33 : vector<8x1xf32>
    %35 = arith.addf %28, %34 : vector<8x1xf32>
    %cst_11 = arith.constant 5.000000e-01 : f32
    %36 = vector.broadcast %cst_11 : f32 to vector<8x1xf32>
    %37 = arith.mulf %36, %35 : vector<8x1xf32>
    %38 = arith.subf %3, %4 : vector<8x32xf32>
    %39 = math.absf %38 : vector<8x32xf32>
    %cst_12 = arith.constant dense<0.000000e+00> : vector<8xf32>
    %40 = vector.multi_reduction <add>, %39, %cst_12 [1] : vector<8x32xf32> to vector<8xf32>
    %41 = vector.shape_cast %40 : vector<8xf32> to vector<8x1xf32>
    %cst_13 = arith.constant 3.125000e-02 : f32
    %42 = vector.broadcast %cst_13 : f32 to vector<8x1xf32>
    %43 = arith.mulf %41, %42 : vector<8x1xf32>
    %cst_14 = arith.constant 1.000000e-01 : f32
    %44 = vector.broadcast %cst_14 : f32 to vector<8x1xf32>
    %45 = arith.subf %44, %37 : vector<8x1xf32>
    %46 = arith.negf %45 : vector<8x1xf32>
    %47 = math.exp %46 : vector<8x1xf32>
    %cst_15 = arith.constant 1.000000e+00 : f32
    %48 = vector.broadcast %cst_15 : f32 to vector<8x1xf32>
    %49 = arith.addf %48, %47 : vector<8x1xf32>
    %50 = arith.divf %48, %49 : vector<8x1xf32>
    %c0_16 = arith.constant 0 : index
    %c0_17 = arith.constant 0 : index
    %51 = vector.load %arg5[%c0_16, %c0_17] : memref<1x1xf32, #tpu.memory_space<vmem>>, vector<1x1xf32>
    %52 = arith.mulf %50, %43 : vector<8x1xf32>
    %53 = vector.shape_cast %52 : vector<8x1xf32> to vector<1x8x1xf32>
    %cst_18 = arith.constant dense<0.000000e+00> : vector<1xf32>
    %54 = vector.multi_reduction <add>, %53, %cst_18 [1, 2] : vector<1x8x1xf32> to vector<1xf32>
    %55 = vector.shape_cast %54 : vector<1xf32> to vector<1x1x1xf32>
    %56 = vector.extract %55[0, 0, 0] : f32 from vector<1x1x1xf32>
    %57 = vector.broadcast %56 : f32 to vector<1x1xf32>
    %58 = arith.addf %51, %57 : vector<1x1xf32>
    %c0_19 = arith.constant 0 : index
    %c0_20 = arith.constant 0 : index
    %59 = vector.load %arg5[%c0_19, %c0_20] : memref<1x1xf32, #tpu.memory_space<vmem>>, vector<1x1xf32>
    tpu.vector_store %arg5[%c0_19, %c0_20], %58 {strides = array<i32>} : memref<1x1xf32, #tpu.memory_space<vmem>>, vector<1x1xf32>,
    %c0_i32_21 = arith.constant 0 : i32
    %60 = arith.cmpi eq, %arg1, %c0_i32_21 : i32
    %61 = arith.extui %60 : i1 to i32
    %c0_i32_22 = arith.constant 0 : i32
    %62 = arith.cmpi ne, %61, %c0_i32_22 : i32
    scf.if %62 {
      %c0_23 = arith.constant 0 : index
      %c0_24 = arith.constant 0 : index
      %63 = vector.load %arg5[%c0_23, %c0_24] : memref<1x1xf32, #tpu.memory_space<vmem>>, vector<1x1xf32>
      %64 = vector.shape_cast %63 : vector<1x1xf32> to vector<1x1x1xf32>
      %c0_25 = arith.constant 0 : index
      %c0_26 = arith.constant 0 : index
      %c0_27 = arith.constant 0 : index
      %65 = vector.load %arg4[%c0_25, %c0_26, %c0_27] : memref<1x1x1xf32, #tpu.memory_space<vmem>>, vector<1x1x1xf32>
      tpu.vector_store %arg4[%c0_25, %c0_26, %c0_27], %64 {strides = array<i32>} : memref<1x1x1xf32, #tpu.memory_space<vmem>>, vector<1x1x1xf32>,
    } else {
    }
    return
  }
  func.func @transform_0(%arg0: i32, %arg1: i32) -> (i32, i32) {
    %c1_i32 = arith.constant 1 : i32
    %0 = arith.muli %arg0, %c1_i32 : i32
    %1 = arith.addi %0, %arg1 : i32
    %c0_i32 = arith.constant 0 : i32
    %2 = arith.minsi %1, %c0_i32 : i32
    %c0_i32_0 = arith.constant 0 : i32
    %c0_i32_1 = arith.constant 0 : i32
    return %2, %c0_i32_0 : i32, i32
  }
  func.func @transform_1(%arg0: i32, %arg1: i32) -> (i32, i32) {
    %c1_i32 = arith.constant 1 : i32
    %0 = arith.muli %arg0, %c1_i32 : i32
    %1 = arith.addi %0, %arg1 : i32
    %c0_i32 = arith.constant 0 : i32
    %2 = arith.minsi %1, %c0_i32 : i32
    %c0_i32_0 = arith.constant 0 : i32
    %c0_i32_1 = arith.constant 0 : i32
    return %2, %c0_i32_0 : i32, i32
  }
  func.func @transform_2(%arg0: i32, %arg1: i32) -> (i32, i32, i32) {
    %c0_i32 = arith.constant 0 : i32
    %c0_i32_0 = arith.constant 0 : i32
    %c0_i32_1 = arith.constant 0 : i32
    return %arg0, %c0_i32, %c0_i32_0 : i32, i32, i32
  }
}

</mosaic_0001>

<bundles_post_ra>
// kernel: tpu_custom_call.1
= control target key start
LH: loop header
LB: loop body
LE: loop exit
PB: predicated region body
PF: predicated region fallthrough
CT: control target
= control target key end

     0   :  { %7 = vsyncpa [#allocation4], 0  ;;  %s343_s0 = inlined_call_operand.hbm [shape: f32[8,32], index: 0, kind: input, shape index: {}]   ;;  %s344_s1 = inlined_call_operand.hbm [shape: f32[8,32], index: 1, kind: input, shape index: {}]   ;;  %s345_s2 = inlined_call_operand.hbm [shape: f32[1,1,1], index: 2, kind: output, shape index: {}]  }
   0x1   :  { %8 = vsyncpa [#allocation7], 0 }
   0x2   :  { %9 = vsyncpa [#allocation5], 0  ;;  %s20_s11 = sshll.u32 %s343_s0, 4  ;;  %s306_s12 = smov [#allocation3]   ;;  %s21_s11 = int_to_ptr.hbm [resolvable:$true] %s20_s11 }
   0x3   :  { %s22_s13 = sshll.u32 %s306_s12, 4  ;;  %s36_s16 = sshll.u32 %s344_s1, 4  ;;  %s23_s13 = int_to_ptr.vmem [resolvable:$true] %s22_s13  ;;  %s37_s16 = int_to_ptr.hbm [resolvable:$true] %s36_s16 }
   0x4   :  { %25 = dma.hbm_to_vmem [thread:$0]  %s21_s11, 128, %s23_s13, [#allocation4]  }
   0x5   :  { %s307_s17 = smov [#allocation6]  }
   0x6   :  { %s38_s18 = sshll.u32 %s307_s17, 4  ;;  %s39_s18 = int_to_ptr.vmem [resolvable:$true] %s38_s18 }
   0x7   :  { %41 = dma.hbm_to_vmem [thread:$0]  %s37_s16, 128, %s39_s18, [#allocation7]  }
   0x8   :  { %300 = dma.done.wait [#allocation4], 128  }
   0x9   :  { %301 = vsyncadd [#allocation4], 4294967168 }
   0xa   :  { %302 = dma.done.wait [#allocation7], 128  }
   0xb   :  { %303 = vsyncadd [#allocation7], 4294967168  ;;  %v308_v0 = vmov 0.6931472   ;;  %vm64_vm0 = vcmask 261120   ;;  %v62_v2 = vld [vmem:[#allocation3] sm:$0xff] }
   0xc   :  { %210 = vrcp.f32 %v308_v0  ;;  %v65_v3 = vsel %vm64_vm0, %v62_v2, 0.0  ;;  %v63_v4 = vld [vmem:[#allocation6] sm:$0xff]  ;;  %vm160_vm14 = vcmask 7168   ;;  %vm60_vm15 = vcmask 0   ;;  %s310_s1 = smov [#allocation8]   ;;  %s187_s22 = sshll.u32 %s345_s2, 4  ;;  %s188_s22 = int_to_ptr.hbm [resolvable:$true] %s187_s22 }
   0xd   :  { %212 = vlog2.f32 %v62_v2  ;;  %66 = vadd.xlane.f32.xlu0 %v65_v3  ;;  %v132_v6 = vsub.f32 %v62_v2, %v63_v4  ;;  %v68_v12 = vsel %vm64_vm0, %v63_v4, 0.0  ;;  %s185_s19 = sshll.u32 %s310_s1, 4  ;;  %s186_s19 = int_to_ptr.vmem [resolvable:$true] %s185_s19 }
   0xe   :  { %214 = vlog2.f32 %v63_v4 }
   0xf   :  { %v133_v8 = vand.u32 2147483647, %v132_v6 }
  0x11   :  { %v134_v10 = vsel %vm64_vm0, %v133_v8, 0.0 }
  0x12   :  { %v211_v1 = vpop.eup %210  ;;  %135 = vadd.xlane.f32.xlu2 %v134_v10 }
  0x13   :  { %v74_v5 = vmul.f32 0.6931472, %v211_v1  ;;  %vm78_vm1 = vweird.f32 %v211_v1  ;;  %v213_v11 = vpop.eup %212 }
  0x14   :  { %v215_v14 = vpop.eup %214  ;;  %v72_v15 = vmul.f32 0.6931472, %v213_v11 }
  0x15   :  { %v75_v7 = vsub.f32 1.0, %v74_v5  ;;  %v86_v17 = vmul.f32 0.6931472, %v215_v14  ;;  %69 = vadd.xlane.f32.xlu0 %v68_v12  ;;  %v309_v14 = vmov 0.0  }
  0x16   :  { %61 = vst.msk [vmem:[#allocation2] sm:$0x1] %vm60_vm15, %v309_v14 }
  0x17   :  { %v76_v9 = vmul.f32 %v211_v1, %v75_v7 }
  0x19   :  { %v77_v13 = vadd.f32 %v211_v1, %v76_v9 }
  0x1b   :  { %v79_v16 = vsel %vm78_vm1, %v211_v1, %v77_v13 }
  0x1c   :  { %v80_v18 = vmul.f32 %v79_v16, %v72_v15  ;;  %v87_v20 = vmul.f32 %v86_v17, %v79_v16 }
  0x1e   :  { %v81_v19 = vmul.f32 %v80_v18, %v62_v2  ;;  %v88_v22 = vmul.f32 %v87_v20, %v63_v4 }
  0x20   :  { %v82_v21 = vsel %vm64_vm0, %v81_v19, 0.0  ;;  %v89_v23 = vsel %vm64_vm0, %v88_v22, 0.0  ;;  %v158_v22 = vld [vmem:[#allocation2] sm:$0x1] }
  0x21   :  { %83 = vadd.xlane.f32.xlu1 %v82_v21 }
  0x29   :  { %90 = vadd.xlane.f32.xlu1 %v89_v23 }
  0x80   :  { %v67_v24 = vpop.xlane.xlu0 %66 }
  0x81   :  { %216 = vrcp.f32 %v67_v24  ;;  %v106_v33 = vand.u32 2147483648, %v67_v24  ;;  %vm100_vm3 = vweird.f32 %v67_v24  ;;  %v104_v35 = vand.u32 2147483647, %v67_v24 }
  0x83   :  { %v107_v40 = vor.u32 1.1754944e-38, %v106_v33  ;;  %vm105_vm5 = vcmp.eq.f32.partialorder %v104_v35, 8.507059e+37 }
  0x85   :  { %v136_v3 = vpop.xlane.xlu2 %135 }
  0x86   :  { %v137_v7 = vmul.f32 0.03125, %v136_v3 }
  0x87   :  { %v217_v25 = vpop.eup %216 }
  0x88   :  { %v96_v26 = vmul.f32 %v217_v25, %v67_v24  ;;  %v70_v27 = vpop.xlane.xlu0 %69  ;;  %vm101_vm2 = vweird.f32 %v217_v25 }
  0x89   :  { %218 = vrcp.f32 %v70_v27  ;;  %vm102_vm4 = vmor %vm100_vm3, %vm101_vm2  ;;  %v125_v41 = vand.u32 2147483648, %v70_v27  ;;  %v123_v43 = vand.u32 2147483647, %v70_v27  ;;  %vm119_vm7 = vweird.f32 %v70_v27 }
  0x8a   :  { %v97_v28 = vsub.f32 1.0, %v96_v26  ;;  %220 = vlog2.f32 %v67_v24 }
  0x8b   :  { %222 = vlog2.f32 %v70_v27  ;;  %v126_v49 = vor.u32 1.1754944e-38, %v125_v41  ;;  %vm124_vm9 = vcmp.eq.f32.partialorder %v123_v43, 8.507059e+37 }
  0x8c   :  { %v98_v29 = vmul.f32 %v217_v25, %v97_v28 }
  0x8e   :  { %v99_v31 = vadd.f32 %v217_v25, %v98_v29 }
  0x8f   :  { %v219_v32 = vpop.eup %218 }
  0x90   :  { %v115_v34 = vmul.f32 %v219_v32, %v70_v27  ;;  %v221_v36 = vpop.eup %220  ;;  %v103_v38 = vsel %vm102_vm4, %v217_v25, %v99_v31  ;;  %vm120_vm6 = vweird.f32 %v219_v32 }
  0x91   :  { %v223_v39 = vpop.eup %222  ;;  %v108_v44 = vsel %vm105_vm5, %v107_v40, %v103_v38  ;;  %v93_v45 = vmul.f32 0.6931472, %v221_v36  ;;  %vm121_vm8 = vmor %vm119_vm7, %vm120_vm6 }
  0x92   :  { %v116_v37 = vsub.f32 1.0, %v115_v34  ;;  %v112_v46 = vmul.f32 0.6931472, %v223_v39 }
  0x93   :  { %v94_v53 = vmul.f32 %v93_v45, %v79_v16 }
  0x94   :  { %v84_v30 = vpop.xlane.xlu1 %83  ;;  %v117_v42 = vmul.f32 %v219_v32, %v116_v37  ;;  %v113_v54 = vmul.f32 %v112_v46, %v79_v16 }
  0x95   :  { %v109_v50 = vmul.f32 %v108_v44, %v84_v30 }
  0x96   :  { %v118_v47 = vadd.f32 %v219_v32, %v117_v42 }
  0x97   :  { %v110_v56 = vsub.f32 %v94_v53, %v109_v50 }
  0x98   :  { %v122_v51 = vsel %vm121_vm8, %v219_v32, %v118_v47 }
  0x99   :  { %v127_v52 = vsel %vm124_vm9, %v126_v49, %v122_v51 }
  0x9c   :  { %v91_v48 = vpop.xlane.xlu1 %90 }
  0x9d   :  { %v128_v55 = vmul.f32 %v127_v52, %v91_v48 }
  0x9f   :  { %v129_v57 = vsub.f32 %v113_v54, %v128_v55 }
  0xa1   :  { %v130_v58 = vadd.f32 %v129_v57, %v110_v56 }
  0xa3   :  { %v131_v59 = vmul.f32 0.5, %v130_v58 }
  0xa5   :  { %v138_v60 = vsub.f32 0.1, %v131_v59 }
  0xa7   :  { %v202_v61 = vmul.f32 -1.442695, %v138_v60 }
  0xa9   :  { %224 = vpow2.f32 %v202_v61 }
  0xaf   :  { %v225_v62 = vpop.eup %224 }
  0xb0   :  { %v142_v63 = vadd.f32 1.0, %v225_v62 }
  0xb2   :  { %226 = vrcp.f32 %v142_v63  ;;  %v154_v4 = vand.u32 2147483648, %v142_v63  ;;  %v152_v6 = vand.u32 2147483647, %v142_v63  ;;  %vm148_vm11 = vweird.f32 %v142_v63 }
  0xb4   :  { %v155_v9 = vor.u32 1.1754944e-38, %v154_v4  ;;  %vm153_vm13 = vcmp.eq.f32.partialorder %v152_v6, 8.507059e+37 }
  0xb8   :  { %v227_v0 = vpop.eup %226 }
  0xb9   :  { %v144_v1 = vmul.f32 %v227_v0, %v142_v63  ;;  %vm149_vm10 = vweird.f32 %v227_v0 }
  0xba   :  { %vm150_vm12 = vmor %vm148_vm11, %vm149_vm10 }
  0xbb   :  { %v145_v2 = vsub.f32 1.0, %v144_v1 }
  0xbd   :  { %v146_v5 = vmul.f32 %v227_v0, %v145_v2 }
  0xbf   :  { %v147_v8 = vadd.f32 %v227_v0, %v146_v5 }
  0xc1   :  { %v151_v10 = vsel %vm150_vm12, %v227_v0, %v147_v8 }
  0xc2   :  { %v156_v11 = vsel %vm153_vm13, %v155_v9, %v151_v10 }
  0xc3   :  { %v159_v12 = vmul.f32 %v156_v11, %v137_v7 }
  0xc5   :  { %v161_v13 = vsel %vm160_vm14, %v159_v12, 0.0 }
  0xc6   :  { %162 = vadd.xlane.f32.xlu2 %v161_v13 }
 0x139   :  { %v163_v15 = vpop.xlane.xlu2 %162 }
 0x13a   :  { %v164_v16 = vrot.slane %v163_v15, 4 }
 0x13c   :  { %v165_v17 = vadd.f32 %v164_v16, %v163_v15 }
 0x13e   :  { %v166_v18 = vrot.slane %v165_v17, 2 }
 0x140   :  { %v167_v19 = vadd.f32 %v166_v18, %v165_v17 }
 0x142   :  { %v168_v20 = vrot.slane %v167_v19, 1 }
 0x144   :  { %v169_v21 = vadd.f32 %v168_v20, %v167_v19 }
 0x146   :  { %203 = vpush %v169_v21 }
 0x177   :  { %s204_s0 = spop %203 }
 0x178   :  { %v171_v23 = vstv %s204_s0 }
 0x179   :  { %v172_v24 = vadd.f32 %v171_v23, %v158_v22 }
 0x17b   :  { %174 = vst.msk [vmem:[#allocation2] sm:$0x1] %vm60_vm15, %v172_v24 }
 0x182   :  { %v178_v25 = vld [vmem:[#allocation2] sm:$0x1] }
 0x183   :  { %179 = vst.msk [vmem:[#allocation8] sm:$0x1] %vm60_vm15, %v178_v25 }
 0x184   :  { %190 = dma.vmem_to_hbm [thread:$0]  %s186_s19, 16, %s188_s22, [#allocation5]  }
 0x185   :  { %304 = dma.done.wait [#allocation5], 16  }
 0x186   :  { %305 = vsyncadd [#allocation5], 4294967280 }
 0x187   :  { %195 = vsyncpa [#allocation4], 1 }
 0x188   :  { %196 = vsyncpa [#allocation7], 1 }
 0x189   :  { %197 = vsyncpa [#allocation5], 1 }

</bundles_post_ra>
